<compile_context>
chip_gen: v7x
topology: tpu7x:2x2x1
jax: 0.10.0
libtpu: 0.0.40
codegen_flags: <defaults>
</compile_context>

<pallas_src>
import jax
import jax.numpy as jnp
from jax import lax
from jax.experimental import pallas as pl
from jax.experimental.pallas import tpu as pltpu

EPS = 1e-5  # eps used by torch LayerNorm and GlobalLayerNorm

# packed-parameter column layout (every column is a per-out-channel vector, length H):
#   0: b1 (conv1x1 bias)    1: g1 (norm_1 weight)   2: be1 (norm_1 bias)
#   3: bdw (dwconv bias)    4: g2 (norm_2 weight)   5: be2 (norm_2 bias)
#   6: alpha1 (PReLU_1 slope, replicated)  7: alpha2 (PReLU_2 slope, replicated)
#   8 .. 8+P-1: depthwise taps wdw[:, p]
_N_FIXED_COLS = 8


def _pack_params(p, P):
    H = p["w1"].shape[0]
    cols = [p["b1"], p["g1"], p["be1"], p["bdw"], p["g2"], p["be2"],
            jnp.full((H, 1), p["alpha1"], jnp.float32),
            jnp.full((H, 1), p["alpha2"], jnp.float32),
            p["wdw"].astype(jnp.float32)]
    return jnp.concatenate(cols, axis=1)          # (H, 8 + P) -> single DMA


def _make_block_kernel(P, dil, pad, T, norm):
    def _normalize(v, g, b):
        if norm == "gln":     # GlobalLayerNorm: stats over (channels, time)
            n = v.shape[0] * v.shape[1]
            mean = jnp.sum(jnp.sum(v, axis=1, keepdims=True),
                           axis=0, keepdims=True) / n
            d = v - mean
            var = jnp.sum(jnp.sum(d * d, axis=1, keepdims=True),
                          axis=0, keepdims=True) / n
        else:                 # cLN: per-timestep LayerNorm over channels
            mean = jnp.mean(v, axis=0, keepdims=True)
            d = v - mean
            var = jnp.mean(d * d, axis=0, keepdims=True)
        return g * d * lax.rsqrt(var + EPS) + b    # rsqrt -> EUP slot (VALU is the busy one)

    def kernel(x_ref, w1_ref, wsc_ref, bsc_ref, pp_ref, o_ref):
        x = x_ref[0]                               # (Cin, T) f32
        pp = pp_ref[...]                           # (H, 8+P) packed per-channel params
        b1, g1, be1 = pp[:, 0:1], pp[:, 1:2], pp[:, 2:3]
        bdw, g2, be2 = pp[:, 3:4], pp[:, 4:5], pp[:, 5:6]
        a1, a2 = pp[:, 6:7], pp[:, 7:8]

        # ---- conv1x1  Cin -> H  (MXU: bf16 operands, f32 accumulate) ----
        c = jnp.dot(w1_ref[...], x.astype(jnp.bfloat16),
                    preferred_element_type=jnp.float32) + b1
        c = jnp.where(c >= 0, c, a1 * c)           # PReLU_1 (learned slope)
        c = _normalize(c, g1, be1)                 # norm_1

        # ---- depthwise dilated conv (zero-padded via masked circular shift) ----
        lane = lax.broadcasted_iota(jnp.int32, c.shape, 1)
        acc = jnp.zeros_like(c)
        for p in range(P):                         # static unroll over taps
            off = p * dil - pad                    # static tap offset
            tap = pp[:, _N_FIXED_COLS + p: _N_FIXED_COLS + p + 1]
            if off == 0:
                shifted = c
            else:
                shifted = pltpu.roll(c, shift=(-off) % T, axis=1)   # c[:, k + off]
                valid = (lane + off >= 0) & (lane + off < T)
                shifted = jnp.where(valid, shifted, 0.0)
            acc = acc + tap * shifted
        y = acc + bdw
        y = jnp.where(y >= 0, y, a2 * y)           # PReLU_2
        y = _normalize(y, g2, be2)                 # norm_2

        # ---- Sc_conv  H -> Cin  + residual link ----
        sc = jnp.dot(wsc_ref[...], y.astype(jnp.bfloat16),
                     preferred_element_type=jnp.float32) + bsc_ref[...]
        o_ref[0] = x + sc

    return kernel


def conv1d_block(x, params, *, kernel_size=3, dilation=1, norm="gln",
                 causal=False):
    """Pallas forward of Conv1D_Block.  x: (batch, in_channels, T) float32."""
    if norm == "bn":
        # TODO(synk): BatchNorm1d ('bn') needs running statistics; not implemented.
        raise NotImplementedError("norm='bn' is not supported by the Pallas kernel")
    Bt, Cin, T = x.shape
    H, P = params["w1"].shape[0], kernel_size
    if not causal and P % 2 == 0:
        # torch's padding = dilation*(P-1)//2 changes the output length for even P
        # (the residual add would fail in torch too); only odd kernels supported.
        raise NotImplementedError("non-causal Conv1D_Block requires odd kernel_size")
    pad = dilation * (P - 1) if causal else dilation * (P - 1) // 2

    packed = _pack_params(params, P)                        # (H, 8+P)
    w1 = params["w1"].astype(jnp.bfloat16)                  # (H, Cin)
    wsc = params["wsc"].astype(jnp.bfloat16)                # (Cin, H)
    bsc = params["bsc"].reshape(Cin, 1).astype(jnp.float32)
    npk = packed.shape[1]

    kernel = _make_block_kernel(P, dilation, pad, T, norm)
    return pl.pallas_call(
        kernel,
        out_shape=jax.ShapeDtypeStruct((Bt, Cin, T), jnp.float32),
        grid=(Bt,),
        in_specs=[
            pl.BlockSpec((1, Cin, T), lambda b: (b, 0, 0)),   # x, one batch elem / step
            pl.BlockSpec((H, Cin),    lambda b: (0, 0)),      # conv1x1 weight (bf16)
            pl.BlockSpec((Cin, H),    lambda b: (0, 0)),      # Sc_conv weight (bf16)
            pl.BlockSpec((Cin, 1),    lambda b: (0, 0)),      # Sc_conv bias
            pl.BlockSpec((H, npk),    lambda b: (0, 0)),      # packed per-channel params
        ],
        out_specs=pl.BlockSpec((1, Cin, T), lambda b: (b, 0, 0)),
        compiler_params=pltpu.CompilerParams(
            dimension_semantics=("parallel",)),
    )(x, w1, wsc, bsc, packed)


# ---------------------------------------------------------------------------
# pure-JAX reference (mirrors torch Conv1D_Block; matmuls in bf16 like the kernel
# so the comparison isolates structural/layout bugs, not MXU rounding)
# ---------------------------------------------------------------------------
def conv1d_block_ref(x, params, *, kernel_size, dilation, norm, causal):
    P, dil = kernel_size, dilation
    Bt, Cin, T = x.shape
    bf = jnp.bfloat16

    def prelu(v, a):
        return jnp.where(v >= 0, v, a * v)

    def norm_fn(v, g, b):
        if norm == "gln":
            mean = jnp.mean(v, axis=(1, 2), keepdims=True)
            var = jnp.mean((v - mean) ** 2, axis=(1, 2), keepdims=True)
        else:  # cln
            mean = jnp.mean(v, axis=1, keepdims=True)
            var = jnp.mean((v - mean) ** 2, axis=1, keepdims=True)
        return g[None] * (v - mean) / jnp.sqrt(var + EPS) + b[None]

    c = jnp.einsum("hc,bct->bht", params["w1"].astype(bf), x.astype(bf),
                   preferred_element_type=jnp.float32) + params["b1"][None]
    c = prelu(c, params["alpha1"])
    c = norm_fn(c, params["g1"], params["be1"])

    pad = dil * (P - 1) if causal else dil * (P - 1) // 2
    cp = jnp.pad(c, ((0, 0), (0, 0), (pad, pad)))
    Tc = T + 2 * pad - dil * (P - 1)
    y = sum(params["wdw"][None, :, p, None] * cp[:, :, p * dil: p * dil + Tc]
            for p in range(P))
    if causal:
        y = y[:, :, :T]                 # torch trims the right-hand pad
    y = y + params["bdw"][None]
    y = prelu(y, params["alpha2"])
    y = norm_fn(y, params["g2"], params["be2"])

    sc = jnp.einsum("ch,bht->bct", params["wsc"].astype(bf), y.astype(bf),
                    preferred_element_type=jnp.float32) \
        + params["bsc"][None, :, None]
    return x + sc


# ---------------------------------------------------------------------------
# deterministic synthetic parameters (shapes as in Conv1D_Block.__init__)
# ---------------------------------------------------------------------------
def init_params(key, Cin, H, P):
    ks = list(jax.random.split(key, 10))

    def nrm(k, shape, s=0.1):
        return s * jax.random.normal(k, shape, jnp.float32)

    return dict(
        w1=nrm(ks[0], (H, Cin)),             # Conv1D(in, out, 1) weight
        b1=nrm(ks[1], (H, 1)),
        g1=1.0 + nrm(ks[2], (H, 1)),         # norm_1 affine
        be1=nrm(ks[3], (H, 1)),
        wdw=nrm(ks[4], (H, P)),              # depthwise conv weight (H,1,P) squeezed
        bdw=nrm(ks[5], (H, 1)),
        g2=1.0 + nrm(ks[6], (H, 1)),         # norm_2 affine
        be2=nrm(ks[7], (H, 1)),
        wsc=nrm(ks[8], (Cin, H)),            # Sc_conv weight
        bsc=nrm(ks[9], (Cin,)),
        alpha1=jnp.float32(0.25),            # learned PReLU slopes (torch default init)
        alpha2=jnp.float32(0.1),
    )


if __name__ == "__main__":
    key = jax.random.PRNGKey(0)
    kx, kp = jax.random.split(key)

    # small shapes consistent with the module; T=128 keeps stores lane-dense
    batch, in_ch, out_ch, T, P = 2, 16, 32, 128, 3
    x = jax.random.normal(kx, (batch, in_ch, T), jnp.float32)
    params = init_params(kp, in_ch, out_ch, P)

    configs = [
        dict(kernel_size=P, dilation=2, norm="gln", causal=False),  # default gLN, dilated
        dict(kernel_size=P, dilation=1, norm="cln", causal=True),   # causal / cLN variant
    ]
    for cfg in configs:
        out = jax.block_until_ready(conv1d_block(x, params, **cfg))
        ref = conv1d_block_ref(x, params, **cfg)
        assert out.shape == x.shape, out.shape
        assert bool(jnp.all(jnp.isfinite(out)))
        err = float(jnp.max(jnp.abs(out - ref)))
        assert err < 1e-2, f"mismatch vs reference: {err} ({cfg})"

    print("KERNEL_OK")
</pallas_src>

<mosaic_0001>
module attributes {stable_mosaic.version = 11 : i64} {
  func.func @kernel(%arg0: i32, %arg1: memref<1x16x128xf32, #tpu.memory_space<vmem>>, %arg2: memref<32x16xbf16, #tpu.memory_space<vmem>>, %arg3: memref<16x32xbf16, #tpu.memory_space<vmem>>, %arg4: memref<16x1xf32, #tpu.memory_space<vmem>>, %arg5: memref<32x11xf32, #tpu.memory_space<vmem>>, %arg6: memref<1x16x128xf32, #tpu.memory_space<vmem>>) attributes {dimension_semantics = [#tpu.dimension_semantics<parallel>], iteration_bounds = array<i64: 2>, scalar_prefetch = 0 : i64, scratch_operands = 0 : i64, tpu.core_type = #tpu.core_type<tc>, window_params = [{transform_indices = @transform_0, window_bounds = array<i64: 1, 16, 128>}, {pipeline_mode = #tpu.pipeline_mode<synchronous>, transform_indices = @transform_1, window_bounds = array<i64: 32, 16>}, {pipeline_mode = #tpu.pipeline_mode<synchronous>, transform_indices = @transform_2, window_bounds = array<i64: 16, 32>}, {pipeline_mode = #tpu.pipeline_mode<synchronous>, transform_indices = @transform_3, window_bounds = array<i64: 16, 1>}, {pipeline_mode = #tpu.pipeline_mode<synchronous>, transform_indices = @transform_4, window_bounds = array<i64: 32, 11>}, {transform_indices = @transform_5, window_bounds = array<i64: 1, 16, 128>}]} {
    %c0 = arith.constant 0 : index
    %c0_0 = arith.constant 0 : index
    %c0_1 = arith.constant 0 : index
    %0 = vector.load %arg1[%c0, %c0_0, %c0_1] : memref<1x16x128xf32, #tpu.memory_space<vmem>>, vector<1x16x128xf32>
    %1 = vector.shape_cast %0 : vector<1x16x128xf32> to vector<16x128xf32>
    %c0_2 = arith.constant 0 : index
    %c0_3 = arith.constant 0 : index
    %2 = vector.load %arg5[%c0_2, %c0_3] : memref<32x11xf32, #tpu.memory_space<vmem>>, vector<32x11xf32>
    %3 = vector.extract_strided_slice %2 {offsets = [0, 0], sizes = [32, 1], strides = [1, 1]} : vector<32x11xf32> to vector<32x1xf32>
    %4 = vector.extract_strided_slice %2 {offsets = [0, 1], sizes = [32, 1], strides = [1, 1]} : vector<32x11xf32> to vector<32x1xf32>
    %5 = vector.extract_strided_slice %2 {offsets = [0, 2], sizes = [32, 1], strides = [1, 1]} : vector<32x11xf32> to vector<32x1xf32>
    %6 = vector.extract_strided_slice %2 {offsets = [0, 3], sizes = [32, 1], strides = [1, 1]} : vector<32x11xf32> to vector<32x1xf32>
    %7 = vector.extract_strided_slice %2 {offsets = [0, 4], sizes = [32, 1], strides = [1, 1]} : vector<32x11xf32> to vector<32x1xf32>
    %8 = vector.extract_strided_slice %2 {offsets = [0, 5], sizes = [32, 1], strides = [1, 1]} : vector<32x11xf32> to vector<32x1xf32>
    %9 = vector.extract_strided_slice %2 {offsets = [0, 6], sizes = [32, 1], strides = [1, 1]} : vector<32x11xf32> to vector<32x1xf32>
    %10 = vector.extract_strided_slice %2 {offsets = [0, 7], sizes = [32, 1], strides = [1, 1]} : vector<32x11xf32> to vector<32x1xf32>
    %c0_4 = arith.constant 0 : index
    %c0_5 = arith.constant 0 : index
    %11 = vector.load %arg2[%c0_4, %c0_5] : memref<32x16xbf16, #tpu.memory_space<vmem>>, vector<32x16xbf16>
    %12 = arith.truncf %1 : vector<16x128xf32> to vector<16x128xbf16>
    %cst = arith.constant dense<0.000000e+00> : vector<32x128xf32>
    %13 = tpu.matmul %11, %12, %cst {dimension_numbers = #tpu.dot_dimension_numbers<[1], [0], [0], [1], [0, 0, 1, 1], [], []>} : vector<32x16xbf16>, vector<16x128xbf16>, vector<32x128xf32> -> vector<32x128xf32>
    %14 = vector.broadcast %3 : vector<32x1xf32> to vector<32x128xf32>
    %15 = arith.addf %13, %14 : vector<32x128xf32>
    %cst_6 = arith.constant 0.000000e+00 : f32
    %16 = vector.broadcast %cst_6 : f32 to vector<32x128xf32>
    %17 = arith.cmpf oge, %15, %16 : vector<32x128xf32>
    %18 = vector.broadcast %9 : vector<32x1xf32> to vector<32x128xf32>
    %19 = arith.mulf %18, %15 : vector<32x128xf32>
    %20 = arith.select %17, %15, %19 : vector<32x128xi1>, vector<32x128xf32>
    %cst_7 = arith.constant dense<0.000000e+00> : vector<32xf32>
    %21 = vector.multi_reduction <add>, %20, %cst_7 [1] : vector<32x128xf32> to vector<32xf32>
    %22 = vector.shape_cast %21 : vector<32xf32> to vector<32x1xf32>
    %cst_8 = arith.constant dense<0.000000e+00> : vector<1xf32>
    %23 = vector.multi_reduction <add>, %22, %cst_8 [0] : vector<32x1xf32> to vector<1xf32>
    %24 = vector.shape_cast %23 : vector<1xf32> to vector<1x1xf32>
    %cst_9 = arith.constant 4.096000e+03 : f32
    %25 = vector.broadcast %cst_9 : f32 to vector<1x1xf32>
    %26 = arith.divf %24, %25 : vector<1x1xf32>
    %27 = vector.broadcast %26 : vector<1x1xf32> to vector<32x128xf32>
    %28 = arith.subf %20, %27 : vector<32x128xf32>
    %29 = arith.mulf %28, %28 : vector<32x128xf32>
    %cst_10 = arith.constant dense<0.000000e+00> : vector<32xf32>
    %30 = vector.multi_reduction <add>, %29, %cst_10 [1] : vector<32x128xf32> to vector<32xf32>
    %31 = vector.shape_cast %30 : vector<32xf32> to vector<32x1xf32>
    %cst_11 = arith.constant dense<0.000000e+00> : vector<1xf32>
    %32 = vector.multi_reduction <add>, %31, %cst_11 [0] : vector<32x1xf32> to vector<1xf32>
    %33 = vector.shape_cast %32 : vector<1xf32> to vector<1x1xf32>
    %cst_12 = arith.constant 4.096000e+03 : f32
    %34 = vector.broadcast %cst_12 : f32 to vector<1x1xf32>
    %35 = arith.divf %33, %34 : vector<1x1xf32>
    %36 = vector.broadcast %4 : vector<32x1xf32> to vector<32x128xf32>
    %37 = arith.mulf %36, %28 : vector<32x128xf32>
    %cst_13 = arith.constant 9.99999974E-6 : f32
    %38 = vector.broadcast %cst_13 : f32 to vector<1x1xf32>
    %39 = arith.addf %35, %38 : vector<1x1xf32>
    %40 = math.rsqrt %39 : vector<1x1xf32>
    %41 = vector.broadcast %40 : vector<1x1xf32> to vector<32x128xf32>
    %42 = arith.mulf %37, %41 : vector<32x128xf32>
    %43 = vector.broadcast %5 : vector<32x1xf32> to vector<32x128xf32>
    %44 = arith.addf %42, %43 : vector<32x128xf32>
    %45 = tpu.iota {dimensions = array<i32: 1>} : vector<32x128xi32>
    %cst_14 = arith.constant 0.000000e+00 : f32
    %46 = vector.broadcast %cst_14 : f32 to vector<32x128xf32>
    %47 = vector.extract_strided_slice %2 {offsets = [0, 8], sizes = [32, 1], strides = [1, 1]} : vector<32x11xf32> to vector<32x1xf32>
    %c2_i32 = arith.constant 2 : i32
    %48 = tpu.dynamic_rotate %44 by %c2_i32 dim 1 : vector<32x128xf32>, i32 -> vector<32x128xf32>
    %c-2_i32 = arith.constant -2 : i32
    %49 = vector.broadcast %c-2_i32 : i32 to vector<32x128xi32>
    %50 = arith.addi %45, %49 : vector<32x128xi32>
    %c0_i32 = arith.constant 0 : i32
    %51 = vector.broadcast %c0_i32 : i32 to vector<32x128xi32>
    %52 = arith.cmpi sge, %50, %51 : vector<32x128xi32>
    %c-2_i32_15 = arith.constant -2 : i32
    %53 = vector.broadcast %c-2_i32_15 : i32 to vector<32x128xi32>
    %54 = arith.addi %45, %53 : vector<32x128xi32>
    %c128_i32 = arith.constant 128 : i32
    %55 = vector.broadcast %c128_i32 : i32 to vector<32x128xi32>
    %56 = arith.cmpi slt, %54, %55 : vector<32x128xi32>
    %57 = arith.andi %52, %56 : vector<32x128xi1>
    %cst_16 = arith.constant 0.000000e+00 : f32
    %58 = vector.broadcast %cst_16 : f32 to vector<32x128xf32>
    %59 = arith.select %57, %48, %58 : vector<32x128xi1>, vector<32x128xf32>
    %60 = vector.broadcast %47 : vector<32x1xf32> to vector<32x128xf32>
    %61 = arith.mulf %60, %59 : vector<32x128xf32>
    %62 = arith.addf %46, %61 : vector<32x128xf32>
    %63 = vector.extract_strided_slice %2 {offsets = [0, 9], sizes = [32, 1], strides = [1, 1]} : vector<32x11xf32> to vector<32x1xf32>
    %64 = vector.broadcast %63 : vector<32x1xf32> to vector<32x128xf32>
    %65 = arith.mulf %64, %44 : vector<32x128xf32>
    %66 = arith.addf %62, %65 : vector<32x128xf32>
    %67 = vector.extract_strided_slice %2 {offsets = [0, 10], sizes = [32, 1], strides = [1, 1]} : vector<32x11xf32> to vector<32x1xf32>
    %c126_i32 = arith.constant 126 : i32
    %68 = tpu.dynamic_rotate %44 by %c126_i32 dim 1 : vector<32x128xf32>, i32 -> vector<32x128xf32>
    %c2_i32_17 = arith.constant 2 : i32
    %69 = vector.broadcast %c2_i32_17 : i32 to vector<32x128xi32>
    %70 = arith.addi %45, %69 : vector<32x128xi32>
    %c0_i32_18 = arith.constant 0 : i32
    %71 = vector.broadcast %c0_i32_18 : i32 to vector<32x128xi32>
    %72 = arith.cmpi sge, %70, %71 : vector<32x128xi32>
    %c2_i32_19 = arith.constant 2 : i32
    %73 = vector.broadcast %c2_i32_19 : i32 to vector<32x128xi32>
    %74 = arith.addi %45, %73 : vector<32x128xi32>
    %c128_i32_20 = arith.constant 128 : i32
    %75 = vector.broadcast %c128_i32_20 : i32 to vector<32x128xi32>
    %76 = arith.cmpi slt, %74, %75 : vector<32x128xi32>
    %77 = arith.andi %72, %76 : vector<32x128xi1>
    %cst_21 = arith.constant 0.000000e+00 : f32
    %78 = vector.broadcast %cst_21 : f32 to vector<32x128xf32>
    %79 = arith.select %77, %68, %78 : vector<32x128xi1>, vector<32x128xf32>
    %80 = vector.broadcast %67 : vector<32x1xf32> to vector<32x128xf32>
    %81 = arith.mulf %80, %79 : vector<32x128xf32>
    %82 = arith.addf %66, %81 : vector<32x128xf32>
    %83 = vector.broadcast %6 : vector<32x1xf32> to vector<32x128xf32>
    %84 = arith.addf %82, %83 : vector<32x128xf32>
    %cst_22 = arith.constant 0.000000e+00 : f32
    %85 = vector.broadcast %cst_22 : f32 to vector<32x128xf32>
    %86 = arith.cmpf oge, %84, %85 : vector<32x128xf32>
    %87 = vector.broadcast %10 : vector<32x1xf32> to vector<32x128xf32>
    %88 = arith.mulf %87, %84 : vector<32x128xf32>
    %89 = arith.select %86, %84, %88 : vector<32x128xi1>, vector<32x128xf32>
    %cst_23 = arith.constant dense<0.000000e+00> : vector<32xf32>
    %90 = vector.multi_reduction <add>, %89, %cst_23 [1] : vector<32x128xf32> to vector<32xf32>
    %91 = vector.shape_cast %90 : vector<32xf32> to vector<32x1xf32>
    %cst_24 = arith.constant dense<0.000000e+00> : vector<1xf32>
    %92 = vector.multi_reduction <add>, %91, %cst_24 [0] : vector<32x1xf32> to vector<1xf32>
    %93 = vector.shape_cast %92 : vector<1xf32> to vector<1x1xf32>
    %cst_25 = arith.constant 4.096000e+03 : f32
    %94 = vector.broadcast %cst_25 : f32 to vector<1x1xf32>
    %95 = arith.divf %93, %94 : vector<1x1xf32>
    %96 = vector.broadcast %95 : vector<1x1xf32> to vector<32x128xf32>
    %97 = arith.subf %89, %96 : vector<32x128xf32>
    %98 = arith.mulf %97, %97 : vector<32x128xf32>
    %cst_26 = arith.constant dense<0.000000e+00> : vector<32xf32>
    %99 = vector.multi_reduction <add>, %98, %cst_26 [1] : vector<32x128xf32> to vector<32xf32>
    %100 = vector.shape_cast %99 : vector<32xf32> to vector<32x1xf32>
    %cst_27 = arith.constant dense<0.000000e+00> : vector<1xf32>
    %101 = vector.multi_reduction <add>, %100, %cst_27 [0] : vector<32x1xf32> to vector<1xf32>
    %102 = vector.shape_cast %101 : vector<1xf32> to vector<1x1xf32>
    %cst_28 = arith.constant 4.096000e+03 : f32
    %103 = vector.broadcast %cst_28 : f32 to vector<1x1xf32>
    %104 = arith.divf %102, %103 : vector<1x1xf32>
    %105 = vector.broadcast %7 : vector<32x1xf32> to vector<32x128xf32>
    %106 = arith.mulf %105, %97 : vector<32x128xf32>
    %cst_29 = arith.constant 9.99999974E-6 : f32
    %107 = vector.broadcast %cst_29 : f32 to vector<1x1xf32>
    %108 = arith.addf %104, %107 : vector<1x1xf32>
    %109 = math.rsqrt %108 : vector<1x1xf32>
    %110 = vector.broadcast %109 : vector<1x1xf32> to vector<32x128xf32>
    %111 = arith.mulf %106, %110 : vector<32x128xf32>
    %112 = vector.broadcast %8 : vector<32x1xf32> to vector<32x128xf32>
    %113 = arith.addf %111, %112 : vector<32x128xf32>
    %c0_30 = arith.constant 0 : index
    %c0_31 = arith.constant 0 : index
    %114 = vector.load %arg3[%c0_30, %c0_31] : memref<16x32xbf16, #tpu.memory_space<vmem>>, vector<16x32xbf16>
    %115 = arith.truncf %113 : vector<32x128xf32> to vector<32x128xbf16>
    %cst_32 = arith.constant dense<0.000000e+00> : vector<16x128xf32>
    %116 = tpu.matmul %114, %115, %cst_32 {dimension_numbers = #tpu.dot_dimension_numbers<[1], [0], [0], [1], [0, 0, 1, 1], [], []>} : vector<16x32xbf16>, vector<32x128xbf16>, vector<16x128xf32> -> vector<16x128xf32>
    %c0_33 = arith.constant 0 : index
    %c0_34 = arith.constant 0 : index
    %117 = vector.load %arg4[%c0_33, %c0_34] : memref<16x1xf32, #tpu.memory_space<vmem>>, vector<16x1xf32>
    %118 = vector.broadcast %117 : vector<16x1xf32> to vector<16x128xf32>
    %119 = arith.addf %116, %118 : vector<16x128xf32>
    %120 = arith.addf %1, %119 : vector<16x128xf32>
    %c0_35 = arith.constant 0 : index
    %c0_36 = arith.constant 0 : index
    %c0_37 = arith.constant 0 : index
    %121 = vector.load %arg6[%c0_35, %c0_36, %c0_37] : memref<1x16x128xf32, #tpu.memory_space<vmem>>, vector<1x16x128xf32>
    %122 = vector.shape_cast %121 : vector<1x16x128xf32> to vector<16x128xf32>
    %123 = vector.shape_cast %120 : vector<16x128xf32> to vector<1x16x128xf32>
    tpu.vector_store %arg6[%c0_35, %c0_36, %c0_37], %123 {strides = array<i32>} : memref<1x16x128xf32, #tpu.memory_space<vmem>>, vector<1x16x128xf32>,
    return
  }
  func.func @transform_0(%arg0: i32) -> (i32, i32, i32) {
    %c0_i32 = arith.constant 0 : i32
    %c0_i32_0 = arith.constant 0 : i32
    %c0_i32_1 = arith.constant 0 : i32
    return %arg0, %c0_i32, %c0_i32_0 : i32, i32, i32
  }
  func.func @transform_1(%arg0: i32) -> (i32, i32) {
    %c0_i32 = arith.constant 0 : i32
    %c0_i32_0 = arith.constant 0 : i32
    %c0_i32_1 = arith.constant 0 : i32
    return %c0_i32, %c0_i32_0 : i32, i32
  }
  func.func @transform_2(%arg0: i32) -> (i32, i32) {
    %c0_i32 = arith.constant 0 : i32
    %c0_i32_0 = arith.constant 0 : i32
    %c0_i32_1 = arith.constant 0 : i32
    return %c0_i32, %c0_i32_0 : i32, i32
  }
  func.func @transform_3(%arg0: i32) -> (i32, i32) {
    %c0_i32 = arith.constant 0 : i32
    %c0_i32_0 = arith.constant 0 : i32
    %c0_i32_1 = arith.constant 0 : i32
    return %c0_i32, %c0_i32_0 : i32, i32
  }
  func.func @transform_4(%arg0: i32) -> (i32, i32) {
    %c0_i32 = arith.constant 0 : i32
    %c0_i32_0 = arith.constant 0 : i32
    %c0_i32_1 = arith.constant 0 : i32
    return %c0_i32, %c0_i32_0 : i32, i32
  }
  func.func @transform_5(%arg0: i32) -> (i32, i32, i32) {
    %c0_i32 = arith.constant 0 : i32
    %c0_i32_0 = arith.constant 0 : i32
    %c0_i32_1 = arith.constant 0 : i32
    return %arg0, %c0_i32, %c0_i32_0 : i32, i32, i32
  }
}

</mosaic_0001>

<bundles_post_ra>
// kernel: tpu_custom_call.1
= control target key start
LH: loop header
LB: loop body
LE: loop exit
PB: predicated region body
PF: predicated region fallthrough
CT: control target
= control target key end

     0   :  { %10 = vsyncpa [#allocation3], 0  ;;  %s1306_s0 = inlined_call_operand.vmem [shape: f32[2,16,128], index: 0, kind: input, shape index: {}]   ;;  %s1307_s1 = inlined_call_operand.vmem [shape: bf16[32,16], index: 1, kind: input, shape index: {}]   ;;  %s1308_s2 = inlined_call_operand.vmem [shape: bf16[16,32], index: 2, kind: input, shape index: {}]   ;;  %s1309_s3 = inlined_call_operand.vmem [shape: f32[16,1], index: 3, kind: input, shape index: {}]   ;;  %s1310_s4 = inlined_call_operand.vmem [shape: f32[32,11], index: 4, kind: input, shape index: {}]   ;;  %s1311_s5 = inlined_call_operand.hbm [shape: f32[2,16,128], index: 5, kind: output, shape index: {}]  }
   0x1   :  { %12 = vsyncpa [#allocation3 + $0x1], 0  ;;  %s1071_s18 = smov 0   ;;  %s1073_s19 = smov 0  }
   0x2   :  { %s1075_s20 = smov 0   ;;  %s1077_s21 = smov 0  }
   0x3 LB: > { %s1092_s22 = sadd.s32 4294967295, %s1021_s21   ;;  %s830_s23 = sadd.s32 4294967294, %s1021_s21   ;;  %s1021_s21 = sphi %s1077_s21, %s1317_s21   ;;  %s1017_s20 = sphi %s1075_s20, %s1316_s20   ;;  %s1013_s19 = sphi %s1073_s19, %s1315_s19   ;;  %s1009_s18 = sphi %s1071_s18, %s1314_s18  }
   0x4   : > { %s1096_s24 = sadd.s32 1, %s1021_s21   ;;  %s135_s25 = sadd.s32 1, %s1017_s20 }
   0x5   : > { %s132_s26 = ssub.s32 %s1021_s21, %s1096_s24  ;;  %p145_p0 = scmp.ne.s32.totalorder %s1017_s20, %s1013_s19 }
   0x6   : > { %p133_p1 = scmp.eq.s32.totalorder %s132_s26, 0  ;;  %p146_p2 = scmp.eq.s32.totalorder %s1092_s22, 1 }
   0x7   : > { %p151_p3 = scmp.ne.s32.totalorder %s1013_s19, %s1009_s18  ;;  %p152_p4 = scmp.eq.s32.totalorder %s830_s23, 1 }
   0x8   : > { %s1107_s27 = scalar_select %p133_p1, %s1017_s20, %s135_s25  }
   0x9   : > { %p1109_p5 = por %p146_p2, %p145_p0  ;;  %p1113_p6 = por %p152_p4, %p151_p3 }
   0xa   : > { %p833_p7 = scmp.ge.s32.totalorder %s1021_s21, 1  ;;  %p190_p8 = scmp.lt.s32.totalorder %s1021_s21, 3 }
   0xc   : > { %p191_p9 = pnand %p833_p7, %p190_p8 }
   0xd   : > { %p218_p10 = scmp.lt.s32.totalorder (!%p191_p9), %s1092_s22, 1  ;;  %v952_v0 = vld [vmem:[%s1307_s1] sm:$0xff] (!%p191_p9)   ;;  %vm265_vm0 = vcmask (!%p191_p9), 130048   ;;  %v1128_v1 = vld [vmem:[%s1310_s4 + $0x10] sm:$0xff] (!%p191_p9)  ;;  %v1023_v3 = vmov (!%p191_p9), 0   ;;  %v1145_v4 = vld [vmem:[%s1310_s4 + $0x8] sm:$0xff] (!%p191_p9) }
   0xe   : > { %194 = sbr.rel (%p191_p9) target bundleno = 1391 (0x56f), region = 40  ;;  %858 = vmatprep.mubr.msk.bf16.mxu0 (!%p191_p9), %vm265_vm0, %v952_v0  ;;  %v1133_v2 = vld [vmem:[%s1310_s4] sm:$0xff] (!%p191_p9)  ;;  %927 = vset.pattern.permute.xlu1 (!%p191_p9), %v1023_v3  ;;  %v1024_v8 = vmov (!%p191_p9), 6   ;;  %v953_v9 = vld [vmem:[%s1307_s1 + $0x8] sm:$0xff] (!%p191_p9)   ;;  %v1161_v10 = vld [vmem:[%s1310_s4 + $0x18] sm:$0xff] (!%p191_p9)  ;;  %v1025_v35 = vmov (!%p191_p9), 1  }
   0xf   : > { %926 = vset.pattern.permute.xlu0 (!%p191_p9), %v1023_v3  ;;  %247 = vperm.xlu1 (!%p191_p9), %927, %v1128_v1   ;;  %v1026_v56 = vmov (!%p191_p9), 2   ;;  %v1027_v57 = vmov (!%p191_p9), 8   ;;  %v1028_v58 = vmov (!%p191_p9), 10   ;;  %v1029_v59 = vmov (!%p191_p9), 9   ;;  %s1032_s6 = smov (!%p191_p9), 2   ;;  %s215_s14 = sand.u32 (!%p191_p9), 1, %s1013_s19  }
  0x10   : > { %237 = vperm.xlu0 (!%p191_p9), %926, %v1133_v2   ;;  %v1030_v62 = vmov (!%p191_p9), 3   ;;  %v1031_v63 = vmov (!%p191_p9), 7   ;;  %vm1037_vm11 = vmmov (!%p191_p9), 0   ;;  %vm705_vm12 = vcmask (!%p191_p9), 261120   ;;  %s849_s23 = sshll.u32 (!%p191_p9), %s1092_s22, 8 }
  0x11   : > { %s1262_s30 = scalar_lea.hbm (!%p191_p9), %s1311_s5, %s849_s23 }
  0x13   : > { %928 = vset.pattern.permute.xlu1 (!%p191_p9), %v1024_v8 }
  0x14   : > { %242 = vperm.xlu0 (!%p191_p9), %926, %v1145_v4   ;;  %326 = vperm.xlu1 (!%p191_p9), %928, %v1133_v2  }
  0x15   : > { %s219_s7 = scalar_select %p218_p10, %s1092_s22, 1 }
  0x16   : > { %s1265_s22 = scalar_lea.sflag [#allocation3], %s215_s14 }
  0x17   : > { %s848_s12 = sshll.u32 %s219_s7, 4  ;;  %s1033_s7 = smov 126  }
  0x18   : > { %s222_s15 = scalar_lea.vmem %s1306_s0, %s848_s12  ;;  %929 = vset.pattern.permute.xlu0 %v1024_v8  ;;  %930 = vset.pattern.permute.xlu1 %v1023_v3 }
  0x19   : > { %v1147_v5 = vld [vmem:[%s222_s15] sm:$0xff]  ;;  %v1149_v6 = vld [vmem:[%s222_s15 + $0x8] sm:$0xff]  ;;  %252 = vperm.xlu1 %930, %v1161_v10   ;;  %330 = vperm.xlu0 %929, %v1145_v4   ;;  %s834_s15 = sshll.u32 %s215_s14, 4 }
  0x1a   : > { %v234_v7 = vpack.c.bf16 %v1149_v6, %v1147_v5  ;;  %s217_s16 = scalar_lea.vmem [#allocation2], %s834_s15 }
  0x1b   : > { %s768_s17 = sshll.u32 %s217_s16, 4  ;;  %s1257_s17 = int_to_ptr.vmem [resolvable:$true] %s768_s17 }
  0x1c   : > { %856 = vmatprep.subr.bf16.mxu0 %v234_v7 }
  0x1d   : > { %857 = vmatpush3.bf16.msra.mxu0 %v234_v7  ;;  %931 = vset.pattern.permute.xlu1 %v1024_v8 }
  0x1e   : > { %338 = vperm.xlu0 %929, %v1161_v10   ;;  %334 = vperm.xlu1 %931, %v1128_v1  }
  0x20   : > { %859 = vmatmul.mubr.msk.bf16.vlgmr.msra.gmra.mrb[0].mxu0 %vm265_vm0, %v953_v9 }
  0x22   : > { %933 = vset.pattern.permute.xlu1 %v1025_v35  ;;  %932 = vset.pattern.permute.xlu0 %v1025_v35 }
  0x8e   : > { %v248_v12 = vpop.permute.xlu1 %247 }
  0x8f   : > { %v238_v11 = vpop.permute.xlu0 %237 }
  0x93   : > { %v243_v13 = vpop.permute.xlu0 %242  ;;  %v327_v14 = vpop.permute.xlu1 %326 }
  0x98   : > { %v331_v15 = vpop.permute.xlu0 %330  ;;  %v253_v16 = vpop.permute.xlu1 %252 }
  0x9d   : > { %v339_v23 = vpop.permute.xlu0 %338  ;;  %v335_v27 = vpop.permute.xlu1 %334 }
  0xf3   : > { %v860_v17 = vpop.f32.mrb[0].mxu0 }
  0xf4   : > { %v306_v18 = vpop.f32.mrb[1].mxu0  ;;  %v315_v24 = vadd.f32 %v860_v17, %v248_v12 }
  0xf5   : > { %v307_v19 = vadd.f32 %v306_v18, %v238_v11  ;;  %v861_v20 = vpop.f32.mrb[2].mxu0 }
  0xf6   : > { %v318_v21 = vadd.f32 %v861_v20, %v253_v16  ;;  %v309_v22 = vpop.f32.mrb[3].mxu0  ;;  %v343_v31 = vmul.f32 %v335_v27, %v315_v24  ;;  %vm323_vm4 = vcmp.ge.f32.partialorder %v315_v24, 0.0 }
  0xf7   : > { %v310_v25 = vadd.f32 %v309_v22, %v243_v13  ;;  %vm321_vm1 = vcmp.ge.f32.partialorder %v307_v19, 0.0  ;;  %v341_v26 = vmul.f32 %v327_v14, %v307_v19 }
  0xf8   : > { %v344_v28 = vmul.f32 %v339_v23, %v318_v21  ;;  %vm324_vm3 = vcmp.ge.f32.partialorder %v318_v21, 0.0  ;;  %v347_v34 = vsel %vm323_vm4, %v315_v24, %v343_v31 }
  0xf9   : > { %v345_v29 = vsel %vm321_vm1, %v307_v19, %v341_v26  ;;  %vm322_vm2 = vcmp.ge.f32.partialorder %v310_v25, 0.0  ;;  %v342_v30 = vmul.f32 %v331_v15, %v310_v25 }
  0xfa   : > { %349 = vadd.xlane.f32.xlu1 %v345_v29  ;;  %v348_v33 = vsel %vm324_vm3, %v318_v21, %v344_v28 }
  0xfb   : > { %v346_v32 = vsel %vm322_vm2, %v310_v25, %v342_v30 }
  0xfc   : > { %351 = vadd.xlane.f32.xlu0 %v346_v32 }
  0xfe   : > { %355 = vadd.xlane.f32.xlu1 %v348_v33 }
 0x100   : > { %353 = vadd.xlane.f32.xlu0 %v347_v34 }
 0x187   : > { %v350_v36 = vpop.xlane.xlu1 %349 }
 0x189   : > { %v352_v37 = vpop.xlane.xlu0 %351 }
 0x18a   : > { %v357_v38 = vadd.f32 %v352_v37, %v350_v36 }
 0x18b   : > { %v356_v41 = vpop.xlane.xlu1 %355 }
 0x18d   : > { %v354_v39 = vpop.xlane.xlu0 %353 }
 0x18e   : > { %v358_v40 = vadd.f32 %v357_v38, %v354_v39 }
 0x190   : > { %v359_v42 = vadd.f32 %v358_v40, %v356_v41 }
 0x192   : > { %v360_v43 = vrot.slane %v359_v42, 4 }
 0x194   : > { %v361_v44 = vadd.f32 %v360_v43, %v359_v42 }
 0x196   : > { %v362_v45 = vrot.slane %v361_v44, 2 }
 0x198   : > { %v363_v46 = vadd.f32 %v362_v45, %v361_v44 }
 0x19a   : > { %v364_v47 = vrot.slane %v363_v46, 1 }
 0x19c   : > { %v365_v48 = vadd.f32 %v364_v47, %v363_v46 }
 0x19e   : > { %v367_v49 = vmul.f32 0.00024414063, %v365_v48 }
 0x1a0   : > { %v1169_v50 = vsub.f32 %v346_v32, %v367_v49  ;;  %v1171_v51 = vsub.f32 %v345_v29, %v367_v49  ;;  %v1177_v54 = vsub.f32 %v347_v34, %v367_v49  ;;  %v1190_v60 = vsub.f32 %v348_v33, %v367_v49 }
 0x1a2   : > { %v373_v52 = vmul.f32 %v1169_v50, %v1169_v50  ;;  %v372_v53 = vmul.f32 %v1171_v51, %v1171_v51  ;;  %v374_v55 = vmul.f32 %v1177_v54, %v1177_v54  ;;  %v375_v61 = vmul.f32 %v1190_v60, %v1190_v60 }
 0x1a4   : > { %378 = vadd.xlane.f32.xlu1 %v373_v52  ;;  %376 = vadd.xlane.f32.xlu0 %v372_v53 }
 0x1a8   : > { %380 = vadd.xlane.f32.xlu0 %v374_v55 }
 0x1b5   : > { %399 = vperm.xlu1 %933, %v1145_v4  }
 0x1b9   : > { %403 = vperm.xlu1 %933, %v1128_v1  }
 0x1bd   : > { %407 = vperm.xlu1 %933, %v1161_v10  }
 0x1be   : > { %395 = vperm.xlu0 %932, %v1133_v2  }
 0x1c1   : > { %934 = vset.pattern.permute.xlu1 %v1026_v56 }
 0x1c2   : > { %421 = vperm.xlu1 %934, %v1133_v2   ;;  %936 = vset.pattern.permute.xlu0 %v1027_v57 }
 0x1c3   : > { %463 = vperm.xlu0 %936, %v1145_v4  }
 0x1c7   : > { %467 = vperm.xlu0 %936, %v1128_v1  }
 0x1cb   : > { %938 = vset.pattern.permute.xlu0 %v1028_v58 }
 0x1cc   : > { %523 = vperm.xlu0 %938, %v1133_v2  }
 0x1d0   : > { %941 = vset.pattern.permute.xlu0 %v1029_v59 }
 0x1d1   : > { %495 = vperm.xlu0 %941, %v1161_v10  }
 0x1d5   : > { %943 = vset.pattern.permute.xlu0 %v1030_v62 }
 0x1d6   : > { %547 = vperm.xlu0 %943, %v1133_v2  }
 0x1da   : > { %555 = vperm.xlu0 %943, %v1128_v1  }
 0x1de   : > { %559 = vperm.xlu0 %943, %v1161_v10  }
 0x1e2   : > { %946 = vset.pattern.permute.xlu0 %v1031_v63 }
 0x1e3   : > { %575 = vperm.xlu0 %946, %v1145_v4  }
 0x1e6   : > { %382 = vadd.xlane.f32.xlu1 %v375_v61 }
 0x1f7   : > { %425 = vperm.xlu1 %934, %v1145_v4  }
 0x1fb   : > { %429 = vperm.xlu1 %934, %v1128_v1  }
 0x1ff   : > { %433 = vperm.xlu1 %934, %v1161_v10  }
 0x203   : > { %935 = vset.pattern.permute.xlu1 %v1027_v57 }
 0x204   : > { %459 = vperm.xlu1 %935, %v1133_v2  }
 0x208   : > { %937 = vset.pattern.permute.xlu1 %v1029_v59 }
 0x209   : > { %483 = vperm.xlu1 %937, %v1133_v2  }
 0x20d   : > { %487 = vperm.xlu1 %937, %v1145_v4  }
 0x211   : > { %491 = vperm.xlu1 %937, %v1128_v1  }
 0x215   : > { %939 = vset.pattern.permute.xlu1 %v1028_v58 }
 0x216   : > { %527 = vperm.xlu1 %939, %v1145_v4  }
 0x21a   : > { %940 = vset.pattern.permute.xlu1 %v1027_v57 }
 0x21b   : > { %471 = vperm.xlu1 %940, %v1161_v10  }
 0x21f   : > { %942 = vset.pattern.permute.xlu1 %v1028_v58  ;;  %v440_v58 = vlaneseq }
 0x220   : > { %531 = vperm.xlu1 %942, %v1128_v1  }
 0x221   : > { %v441_v61 = vand.u32 127, %v440_v58 }
 0x224   : > { %535 = vperm.xlu1 %942, %v1161_v10  }
 0x228   : > { %944 = vset.pattern.permute.xlu1 %v1030_v62 }
 0x229   : > { %551 = vperm.xlu1 %944, %v1145_v4  }
 0x22d   : > { %945 = vset.pattern.permute.xlu1 %v1031_v63  ;;  %v450_v63 = vadd.s32 4294967294, %v441_v61 }
 0x22e   : > { %571 = vperm.xlu1 %945, %v1133_v2  }
 0x22f   : > { %vm451_vm5 = vcmp.ge.s32.totalorder %v450_v63, 0  ;;  %v1034_v63 = vmov 4  }
 0x231   : > { %v379_v0 = vpop.xlane.xlu1 %378  ;;  %v377_v9 = vpop.xlane.xlu0 %376 }
 0x232   : > { %579 = vperm.xlu1 %945, %v1128_v1   ;;  %v384_v14 = vadd.f32 %v379_v0, %v377_v9 }
 0x235   : > { %v400_v7 = vpop.permute.xlu1 %399  ;;  %v381_v12 = vpop.xlane.xlu0 %380 }
 0x236   : > { %v385_v15 = vadd.f32 %v384_v14, %v381_v12  ;;  %v411_v27 = vmul.f32 %v400_v7, %v1169_v50  ;;  %v514_v7 = vadd.s32 2, %v441_v61  ;;  %947 = vset.pattern.permute.xlu1 %v1034_v63 }
 0x238   : > { %vm516_vm6 = vcmp.lt.s32.totalorder %v514_v7, 128 }
 0x239   : > { %v404_v8 = vpop.permute.xlu1 %403 }
 0x23a   : > { %v412_v33 = vmul.f32 %v404_v8, %v1177_v54 }
 0x23d   : > { %v408_v11 = vpop.permute.xlu1 %407  ;;  %v396_v26 = vpop.permute.xlu0 %395 }
 0x23e   : > { %v410_v28 = vmul.f32 %v396_v26, %v1171_v51  ;;  %v413_v39 = vmul.f32 %v408_v11, %v1190_v60 }
 0x241   : > { %v422_v13 = vpop.permute.xlu1 %421 }
 0x242   : > { %v464_v46 = vpop.permute.xlu0 %463 }
 0x246   : > { %v468_v48 = vpop.permute.xlu0 %467 }
 0x24b   : > { %v524_v50 = vpop.permute.xlu0 %523 }
 0x250   : > { %v496_v52 = vpop.permute.xlu0 %495 }
 0x255   : > { %v548_v54 = vpop.permute.xlu0 %547 }
 0x259   : > { %v556_v56 = vpop.permute.xlu0 %555 }
 0x25d   : > { %v560_v59 = vpop.permute.xlu0 %559 }
 0x262   : > { %v576_v62 = vpop.permute.xlu0 %575 }
 0x273   : > { %v383_v16 = vpop.xlane.xlu1 %382 }
 0x274   : > { %v386_v17 = vadd.f32 %v385_v15, %v383_v16 }
 0x276   : > { %v387_v18 = vrot.slane %v386_v17, 4 }
 0x277   : > { %v426_v30 = vpop.permute.xlu1 %425 }
 0x278   : > { %v388_v19 = vadd.f32 %v387_v18, %v386_v17 }
 0x27a   : > { %v389_v20 = vrot.slane %v388_v19, 2 }
 0x27b   : > { %v430_v37 = vpop.permute.xlu1 %429 }
 0x27c   : > { %v390_v21 = vadd.f32 %v389_v20, %v388_v19 }
 0x27e   : > { %v391_v22 = vrot.slane %v390_v21, 1 }
 0x27f   : > { %v434_v41 = vpop.permute.xlu1 %433 }
 0x280   : > { %v392_v23 = vadd.f32 %v391_v22, %v390_v21 }
 0x282   : > { %v393_v24 = vmul.f32 0.00024414063, %v392_v23 }
 0x283   : > { %v460_v43 = vpop.permute.xlu1 %459 }
 0x284   : > { %v414_v25 = vadd.f32 1e-05, %v393_v24 }
 0x286   : > { %955 = vrsqrt.f32 %v414_v25 }
 0x288   : > { %v484_v44 = vpop.permute.xlu1 %483 }
 0x28c   : > { %v488_v45 = vpop.permute.xlu1 %487 }
 0x290   : > { %v956_v29 = vpop.eup %955  ;;  %v492_v47 = vpop.permute.xlu1 %491 }
 0x291   : > { %v417_v31 = vmul.f32 %v956_v29, %v411_v27  ;;  %v416_v32 = vmul.f32 %v956_v29, %v410_v28  ;;  %v418_v36 = vmul.f32 %v956_v29, %v412_v33  ;;  %v419_v40 = vmul.f32 %v956_v29, %v413_v39 }
 0x293   : > { %v437_v34 = vadd.f32 %v426_v30, %v417_v31  ;;  %v436_v35 = vadd.f32 %v422_v13, %v416_v32  ;;  %v1215_v38 = vadd.f32 %v430_v37, %v418_v36  ;;  %v1220_v42 = vadd.f32 %v434_v41, %v419_v40 }
 0x295   : > { %444 = vrot.lane.b32.xlu0 %v437_v34, %s1032_s6  ;;  %442 = vrot.lane.b32.xlu1 %v436_v35, %s1032_s6  ;;  %v528_v49 = vpop.permute.xlu1 %527  ;;  %v498_v13 = vmul.f32 %v484_v44, %v436_v35  ;;  %v499_v22 = vmul.f32 %v488_v45, %v437_v34 }
 0x299   : > { %506 = vrot.lane.b32.xlu0 %v436_v35, %s1033_s7  ;;  %446 = vrot.lane.b32.xlu1 %v1215_v38, %s1032_s6 }
 0x29a   : > { %v472_v51 = vpop.permute.xlu1 %471 }
 0x29d   : > { %583 = vperm.xlu0 %946, %v1161_v10   ;;  %508 = vrot.lane.b32.xlu1 %v437_v34, %s1033_s7  ;;  %v500_v34 = vmul.f32 %v492_v47, %v1215_v38 }
 0x29f   : > { %v532_v53 = vpop.permute.xlu1 %531 }
 0x2a1   : > { %448 = vrot.lane.b32.xlu1 %v1220_v42, %s1032_s6  ;;  %948 = vset.pattern.permute.xlu0 %v1034_v63  ;;  %s959_s6 = scalar_lea.vmem %s1257_s17, 256 }
 0x2a2   : > { %p960_p11 = scmp.ne.s32.totalorder %s1257_s17, %s959_s6 }
 0x2a3   : > { %v536_v55 = vpop.permute.xlu1 %535 }
 0x2a4   : > { %p961_p12 = pnand %p960_p11, %p1109_p5 }
 0x2a5   : > { %510 = vrot.lane.b32.xlu1 %v1215_v38, %s1033_s7 }
 0x2a6   : > { %p962_p13 = pneg %p961_p12 }
 0x2a8   : > { %v552_v57 = vpop.permute.xlu1 %551 }
 0x2a9   : > { %512 = vrot.lane.b32.xlu1 %v1220_v42, %s1033_s7  ;;  %s1038_s7 = smov [#allocation2]  }
 0x2aa   : > { %s963_s8 = sshll.u32 %s1038_s7, 4  ;;  %s964_s8 = int_to_ptr.vmem [resolvable:$false] %s963_s8 }
 0x2ab   : > { %s965_s9 = scalar_lea.vmem %s964_s8, 512  ;;  %p966_p0 = scmp.lt.s32.totalorder %s1257_s17, %s964_s8 }
 0x2ac   : > { %p967_p1 = scmp.lt.s32.totalorder %s965_s9, %s959_s6 }
 0x2ad   : > { %v572_v60 = vpop.permute.xlu1 %571 }
 0x2ae   : > { %p968_p2 = por %p967_p1, %p966_p0 }
 0x2b0   : > { %p969_p3 = pnand %p968_p2, %p962_p13 }
 0x2b1   : > { %v580_v0 = vpop.permute.xlu1 %579 }
 0x307   : > { %v445_v8 = vpop.permute.xlu0 %444  ;;  %v443_v9 = vpop.permute.xlu1 %442 }
 0x308   : > { %v454_v11 = vsel %vm451_vm5, %v443_v9, 0.0  ;;  %v455_v14 = vsel %vm451_vm5, %v445_v8, 0.0 }
 0x309   : > { %v474_v12 = vmul.f32 %v460_v43, %v454_v11  ;;  %v475_v20 = vmul.f32 %v464_v46, %v455_v14  ;;  %v501_v46 = vmul.f32 %v496_v52, %v1220_v42 }
 0x30b   : > { %v507_v15 = vpop.permute.xlu0 %506  ;;  %v447_v16 = vpop.permute.xlu1 %446  ;;  %v502_v18 = vadd.f32 %v498_v13, %v474_v12  ;;  %v503_v26 = vadd.f32 %v499_v22, %v475_v20 }
 0x30c   : > { %v518_v17 = vsel %vm516_vm6, %v507_v15, 0.0  ;;  %v456_v28 = vsel %vm451_vm5, %v447_v16, 0.0 }
 0x30d   : > { %v538_v19 = vmul.f32 %v524_v50, %v518_v17  ;;  %v476_v33 = vmul.f32 %v468_v48, %v456_v28 }
 0x30f   : > { %v542_v21 = vadd.f32 %v538_v19, %v502_v18  ;;  %v509_v23 = vpop.permute.xlu1 %508  ;;  %v504_v41 = vadd.f32 %v500_v34, %v476_v33 }
 0x310   : > { %v519_v24 = vsel %vm516_vm6, %v509_v23, 0.0 }
 0x311   : > { %v562_v25 = vadd.f32 %v548_v54, %v542_v21  ;;  %v539_v27 = vmul.f32 %v528_v49, %v519_v24  ;;  %v1035_v24 = vmov 5  }
 0x313   : > { %vm566_vm7 = vcmp.ge.f32.partialorder %v562_v25, 0.0  ;;  %v586_v29 = vmul.f32 %v572_v60, %v562_v25  ;;  %v543_v30 = vadd.f32 %v539_v27, %v503_v26  ;;  %v449_v31 = vpop.permute.xlu1 %448  ;;  %v688_v26 = vld [vmem:[%s1309_s3] sm:$0xff] }
 0x314   : > { %v457_v36 = vsel %vm451_vm5, %v449_v31, 0.0 }
 0x315   : > { %v590_v32 = vsel %vm566_vm7, %v562_v25, %v586_v29  ;;  %v563_v35 = vadd.f32 %v552_v57, %v543_v30  ;;  %v477_v43 = vmul.f32 %v472_v51, %v457_v36  ;;  %v1036_v25 = vmov 0.0  }
 0x316   : > { %594 = vadd.xlane.f32.xlu1 %v590_v32  ;;  %862 = vmatprep.subr.bf16.mxu1 %v1036_v25 }
 0x317   : > { %v511_v37 = vpop.permute.xlu1 %510  ;;  %vm567_vm8 = vcmp.ge.f32.partialorder %v563_v35, 0.0  ;;  %v587_v39 = vmul.f32 %v576_v62, %v563_v35  ;;  %v505_v54 = vadd.f32 %v501_v46, %v477_v43  ;;  %866 = vmatprep.mubr.msk.bf16.mxu1 %vm1037_vm11, %v1036_v25 }
 0x318   : > { %v520_v40 = vsel %vm516_vm6, %v511_v37, 0.0 }
 0x319   : > { %v540_v44 = vmul.f32 %v532_v53, %v520_v40  ;;  %v591_v45 = vsel %vm567_vm8, %v563_v35, %v587_v39 }
 0x31a   : > { %596 = vadd.xlane.f32.xlu0 %v591_v45 }
 0x31b   : > { %v544_v49 = vadd.f32 %v540_v44, %v504_v41  ;;  %v513_v48 = vpop.permute.xlu1 %512 }
 0x31c   : > { %v521_v50 = vsel %vm516_vm6, %v513_v48, 0.0  ;;  %v584_v62 = vpop.permute.xlu0 %583 }
 0x31d   : > { %v541_v57 = vmul.f32 %v536_v55, %v521_v50  ;;  %v564_v58 = vadd.f32 %v556_v56, %v544_v49 }
 0x31f   : > { %v545_v38 = vadd.f32 %v541_v57, %v505_v54  ;;  %vm568_vm9 = vcmp.ge.f32.partialorder %v564_v58, 0.0  ;;  %v588_v47 = vmul.f32 %v580_v0, %v564_v58 }
 0x321   : > { %v565_v60 = vadd.f32 %v560_v59, %v545_v38  ;;  %v592_v61 = vsel %vm568_vm9, %v564_v58, %v588_v47 }
 0x322   : > { %598 = vadd.xlane.f32.xlu1 %v592_v61 }
 0x323   : > { %v589_v51 = vmul.f32 %v584_v62, %v565_v60  ;;  %vm569_vm10 = vcmp.ge.f32.partialorder %v565_v60, 0.0 }
 0x325   : > { %v593_v53 = vsel %vm569_vm10, %v565_v60, %v589_v51 }
 0x326   : > { %600 = vadd.xlane.f32.xlu0 %v593_v53 }
 0x3a3   : > { %v595_v42 = vpop.xlane.xlu1 %594 }
 0x3a7   : > { %v597_v52 = vpop.xlane.xlu0 %596 }
 0x3a8   : > { %v602_v8 = vadd.f32 %v597_v52, %v595_v42 }
 0x3af   : > { %v599_v7 = vpop.xlane.xlu1 %598 }
 0x3b0   : > { %v603_v55 = vadd.f32 %v602_v8, %v599_v7  ;;  %v954_v7 = vld [vmem:[%s1308_s2] sm:$0xff]  }
 0x3b3   : > { %v601_v56 = vpop.xlane.xlu0 %600 }
 0x3b4   : > { %v604_v9 = vadd.f32 %v603_v55, %v601_v56 }
 0x3b6   : > { %v605_v11 = vrot.slane %v604_v9, 4 }
 0x3b8   : > { %v606_v0 = vadd.f32 %v605_v11, %v604_v9 }
 0x3ba   : > { %v607_v59 = vrot.slane %v606_v0, 2 }
 0x3bc   : > { %v608_v12 = vadd.f32 %v607_v59, %v606_v0 }
 0x3be   : > { %v609_v13 = vrot.slane %v608_v12, 1 }
 0x3c0   : > { %v610_v14 = vadd.f32 %v609_v13, %v608_v12 }
 0x3c2   : > { %v611_v15 = vmul.f32 0.00024414063, %v610_v14 }
 0x3c4   : > { %v613_v16 = vsub.f32 %v591_v45, %v611_v15  ;;  %v612_v17 = vsub.f32 %v590_v32, %v611_v15  ;;  %v615_v20 = vsub.f32 %v593_v53, %v611_v15  ;;  %v614_v21 = vsub.f32 %v592_v61, %v611_v15 }
 0x3c6   : > { %v617_v18 = vmul.f32 %v613_v16, %v613_v16  ;;  %v616_v19 = vmul.f32 %v612_v17, %v612_v17  ;;  %v619_v22 = vmul.f32 %v615_v20, %v615_v20  ;;  %v618_v23 = vmul.f32 %v614_v21, %v614_v21 }
 0x3c8   : > { %622 = vadd.xlane.f32.xlu0 %v617_v18  ;;  %620 = vadd.xlane.f32.xlu1 %v616_v19 }
 0x3cc   : > { %626 = vadd.xlane.f32.xlu0 %v619_v22  ;;  %624 = vadd.xlane.f32.xlu1 %v618_v23 }
 0x3dd   : > { %639 = vperm.xlu1 %947, %v1133_v2  }
 0x3e1   : > { %647 = vperm.xlu1 %947, %v1128_v1  }
 0x3e2   : > { %643 = vperm.xlu0 %948, %v1145_v4  }
 0x3e5   : > { %651 = vperm.xlu1 %947, %v1161_v10  }
 0x3e6   : > { %951 = vset.pattern.permute.xlu0 %v1023_v3 }
 0x3e9   : > { %949 = vset.pattern.permute.xlu1 %v1035_v24 }
 0x3ea   : > { %665 = vperm.xlu1 %949, %v1133_v2   ;;  %v689_v2 = vld [vmem:[%s1309_s3 + $0x8] sm:$0xff] }
 0x3eb   : > { %697 = vperm.xlu0 %951, %v689_v2  }
 0x3ee   : > { %669 = vperm.xlu1 %949, %v1145_v4  }
 0x3f2   : > { %673 = vperm.xlu1 %949, %v1128_v1  }
 0x3f6   : > { %677 = vperm.xlu1 %949, %v1161_v10  }
 0x3fa   : > { %950 = vset.pattern.permute.xlu1 %v1023_v3 }
 0x3fb   : > { %692 = vperm.xlu1 %950, %v688_v26  }
 0x455   : > { %v623_v4 = vpop.xlane.xlu0 %622  ;;  %v621_v1 = vpop.xlane.xlu1 %620 }
 0x456   : > { %v628_v27 = vadd.f32 %v623_v4, %v621_v1 }
 0x459   : > { %v625_v10 = vpop.xlane.xlu1 %624  ;;  %v627_v3 = vpop.xlane.xlu0 %626 }
 0x45a   : > { %v629_v28 = vadd.f32 %v628_v27, %v625_v10 }
 0x45c   : > { %v630_v29 = vadd.f32 %v629_v28, %v627_v3 }
 0x45d   : > { %v640_v30 = vpop.permute.xlu1 %639 }
 0x45e   : > { %v631_v31 = vrot.slane %v630_v29, 4  ;;  %v654_v49 = vmul.f32 %v640_v30, %v612_v17 }
 0x460   : > { %v632_v32 = vadd.f32 %v631_v31, %v630_v29 }
 0x461   : > { %v648_v33 = vpop.permute.xlu1 %647  ;;  %v644_v45 = vpop.permute.xlu0 %643 }
 0x462   : > { %v633_v35 = vrot.slane %v632_v32, 2  ;;  %v655_v48 = vmul.f32 %v644_v45, %v613_v16  ;;  %v656_v50 = vmul.f32 %v648_v33, %v614_v21 }
 0x464   : > { %v634_v36 = vadd.f32 %v633_v35, %v632_v32 }
 0x465   : > { %v652_v34 = vpop.permute.xlu1 %651 }
 0x466   : > { %v635_v37 = vrot.slane %v634_v36, 1  ;;  %v657_v54 = vmul.f32 %v652_v34, %v615_v20 }
 0x468   : > { %v636_v39 = vadd.f32 %v635_v37, %v634_v36 }
 0x469   : > { %v666_v41 = vpop.permute.xlu1 %665 }
 0x46a   : > { %v637_v40 = vmul.f32 0.00024414063, %v636_v39  ;;  %v698_v56 = vpop.permute.xlu0 %697 }
 0x46c   : > { %v658_v43 = vadd.f32 1e-05, %v637_v40 }
 0x46d   : > { %v670_v44 = vpop.permute.xlu1 %669 }
 0x46e   : > { %957 = vrsqrt.f32 %v658_v43 }
 0x471   : > { %v674_v46 = vpop.permute.xlu1 %673 }
 0x475   : > { %v678_v51 = vpop.permute.xlu1 %677 }
 0x478   : > { %v958_v57 = vpop.eup %957 }
 0x479   : > { %v660_v58 = vmul.f32 %v958_v57, %v654_v49  ;;  %v661_v38 = vmul.f32 %v958_v57, %v655_v48  ;;  %v662_v47 = vmul.f32 %v958_v57, %v656_v50  ;;  %v663_v60 = vmul.f32 %v958_v57, %v657_v54 }
 0x47a   : > { %v693_v8 = vpop.permute.xlu1 %692 }
 0x47b   : > { %v680_v61 = vadd.f32 %v666_v41, %v660_v58  ;;  %v681_v62 = vadd.f32 %v670_v44, %v661_v38  ;;  %v682_v53 = vadd.f32 %v674_v46, %v662_v47  ;;  %v683_v63 = vadd.f32 %v678_v51, %v663_v60 }
 0x47d   : > { %v686_v42 = vpack.c.bf16 %v681_v62, %v680_v61  ;;  %v687_v52 = vpack.c.bf16 %v683_v63, %v682_v53 }
 0x47f   : > { %863 = vmatpush3.bf16.msra.mxu1 %v686_v42 }
 0x480   : > { %864 = vmatprep.subr.bf16.mxu1 %v1036_v25 }
 0x483   : > { %865 = vmatpush3.bf16.msra.mxu1 %v687_v52 }
 0x486   : > { %867 = vmatmul.mubr.msk.bf16.vlgmr.msra.gmra.mrb[0].mxu1 %vm705_vm12, %v954_v7 }
 0x559   : > { %v743_v55 = vpop.f32.mrb[0].mxu1 }
 0x55a   : > { %v744_v9 = vadd.f32 %v743_v55, %v693_v8  ;;  %v868_v11 = vpop.f32.mrb[1].mxu1 }
 0x55b   : > { %v746_v0 = vpop.f32.mrb[2].mxu1 }
 0x55c   : > { %v750_v59 = vadd.f32 %v744_v9, %v1147_v5  ;;  %v747_v12 = vadd.f32 %v746_v0, %v698_v56  ;;  %v869_v13 = vpop.f32.mrb[3].mxu1 }
 0x55e   : > { %752 = vst [vmem:[%s217_s16] sm:$0xff] %v750_v59  ;;  %v751_v14 = vadd.f32 %v747_v12, %v1149_v6 }
 0x560   : > { %753 = vst [vmem:[%s217_s16 + $0x8] sm:$0xff] %v751_v14 }
 0x561   : > { %972 = shalt.err (!%p969_p3)
}
 0x562   : > { %s973_s10 = scalar_lea.hbm %s1262_s30, 256  ;;  %s977_s13 = scalar_lea.hbm %s1311_s5, 512 }
 0x563   : > { %p974_p4 = scmp.ne.s32.totalorder %s1262_s30, %s973_s10  ;;  %p978_p9 = scmp.lt.u32.totalorder %s1262_s30, %s1311_s5 }
 0x564   : > { %p979_p10 = scmp.lt.u32.totalorder %s977_s13, %s973_s10  ;;  %p981_p12 = scmp.lt.u32.totalorder %s973_s10, %s1262_s30 }
 0x565   : > { %p975_p7 = pnand %p974_p4, %p1109_p5 }
 0x566   : > { %p980_p11 = por %p979_p10, %p978_p9 }
 0x567   : > { %p976_p8 = pneg %p975_p7 }
 0x568   : > { %p982_p13 = por %p981_p12, %p980_p11 }
 0x56a   : > { %p983_p0 = pnand %p982_p13, %p976_p8 }
 0x56c   : > { %986 = shalt.err (!%p983_p0)
}
 0x56d   : > { %s1039_s16 = smov 128   ;;  %s1040_s23 = smov 8  }
 0x56e   : > { %870 = dma.vmem_to_hbm [thread:$0]  (%p1109_p5), %s1257_s17, 256, %s1262_s30, %s1265_s22, %s1039_s16, %s1039_s16, %s1040_s23  }
 0x56f PF: > { %p876_p1 = scmp.ge.s32.totalorder %s1021_s21, 2  ;;  %s783_s25 = sand.u32 1, %s1009_s18  }
 0x570   : > { %s784_s26 = scalar_lea.sflag [#allocation3], %s783_s25 }
 0x571   : > { %p873_p2 = pnand %p876_p1, %p1113_p6 }
 0x573   : > { %1004 = dma.done.wait (!%p873_p2), %s784_s26, 256  }
 0x574   : > { %1006 = vsyncadd (!%p873_p2), %s784_s26, 4294967040  ;;  %p15_p3 = scmp.ge.s32.totalorder %s1096_s24, 4   ;;  %s1314_s18 = smov %s1013_s19 }
 0x575   : > { %s1315_s19 = smov %s1017_s20  ;;  %s1316_s20 = smov %s1107_s27 }
 0x576   : > { %s1317_s21 = smov %s1096_s24  ;;  %17 = sbr.rel (!%p15_p3) target bundleno = 3 (0x3), region = 75 }
 0x57d   :  { %789 = vsyncpa [#allocation3], 1 }
 0x57e   :  { %791 = vsyncpa [#allocation3 + $0x1], 1 }

</bundles_post_ra>
